<compile_context>
chip_gen: v7x
topology: tpu7x:2x2x1
jax: 0.10.0
libtpu: 0.0.40
codegen_flags: <defaults>
</compile_context>

<pallas_src>
import math

import jax
import jax.numpy as jnp
from jax.experimental import pallas as pl
from jax.experimental.pallas import tpu as pltpu


def _make_embed_kernel(scale: float, tile_t: int, n_tokens: int):
    def kernel(ids_ref, table_ref, out_ref, sem):
        # ids_ref  : (n_pad,) int32 token ids in SMEM (scalar prefetch, pre-clamped)
        # table_ref: (vocab, d_model) embedding table, left in HBM
        # out_ref  : (tile_t, d_model) pipelined output tile in VMEM
        # sem      : (1,) shared DMA semaphore (all row copies signal it)
        base = pl.program_id(0) * tile_t
        # Valid (non-padding) rows in this tile; n_tokens is a compile-time
        # constant, so only the last tile sees a partial count.
        rows = jnp.minimum(n_tokens - base, tile_t)

        # Phase 1: issue every row gather up front (decoupled from the waits).
        # Each DMA copies one embedding row HBM -> out_ref and signals the
        # single shared semaphore.
        @pl.loop(0, rows)
        def _(t):
            tok = ids_ref[base + t]
            pltpu.make_async_copy(
                table_ref.at[pl.ds(tok, 1)],
                out_ref.at[pl.ds(t, 1)],
                sem.at[0],
            ).start()

        # Phase 2: drain. All row copies have identical size, so `rows` waits
        # on the shared semaphore guarantee every gather has landed
        # (completion order does not matter).
        @pl.loop(0, rows)
        def _(t):
            pltpu.make_async_copy(
                table_ref.at[pl.ds(0, 1)],   # descriptor only sets the wait size
                out_ref.at[pl.ds(0, 1)],
                sem.at[0],
            ).wait()

        # Fused sqrt(d_model) scaling: one in-place, lane-dense rewrite of the
        # tile. Padded tail rows hold stale VMEM and are sliced off by the
        # wrapper, so scaling them is harmless.
        out_ref[...] = (out_ref[...] * scale).astype(out_ref.dtype)

    return kernel


def _choose_tile(n_tokens: int, d_model: int, itemsize: int):
    """Pick the token tile size from a per-generation VMEM budget."""
    try:
        vmem_cap = int(pltpu.get_tpu_info().vmem_capacity_bytes)
    except Exception:
        vmem_cap = 64 << 20  # conservative default: v7x per-TensorCore VMEM

    # The output tile is the only large VMEM buffer and the BlockSpec pipeline
    # double-buffers it.
    budget = min(vmem_cap // 4, 32 << 20)
    tile = budget // (2 * d_model * itemsize)
    tile = min(tile, 1024)  # bound per-step DMA issue loop / outstanding DMAs
    # Keep at least two grid steps whenever there is enough work so v7x's two
    # TensorCores both receive iterations of the "parallel" grid axis.
    half = -(-n_tokens // 2)
    tile = min(tile, -(-half // 8) * 8)
    tile = max(8, (tile // 8) * 8)  # output sublane dim must be a multiple of 8

    needed = 2 * tile * d_model * itemsize
    vmem_limit = int(min(max(needed + (8 << 20), 32 << 20), (vmem_cap * 3) // 4))
    return tile, vmem_limit


def input_embeddings(x, embedding_table):
    """x: (batch, seq) integer token ids; embedding_table: (vocab, d_model)."""
    batch, seq = x.shape
    vocab, d_model = embedding_table.shape
    n = batch * seq
    scale = math.sqrt(d_model)
    itemsize = jnp.dtype(embedding_table.dtype).itemsize

    tile_t, vmem_limit = _choose_tile(n, d_model, itemsize)
    n_pad = pl.cdiv(n, tile_t) * tile_t

    # Clamp once, vectorized, in the wrapper: guards the HBM row DMAs against
    # out-of-range ids and keeps per-row scalar work out of the kernel.
    # NOTE: PyTorch nn.Embedding would raise on out-of-range ids; here they
    # are silently clamped to [0, vocab-1].
    ids = jnp.clip(x.reshape(-1).astype(jnp.int32), 0, vocab - 1)
    if n_pad != n:
        ids = jnp.concatenate([ids, jnp.zeros((n_pad - n,), jnp.int32)])
    # NOTE: ids live in SMEM for the whole call (scalar prefetch) — fine up to
    # ~1e5 tokens; for much longer sequences switch to a per-tile SMEM block.

    # TODO(synk): add a VMEM-resident-table fast path (vectorized in-VMEM
    # gather via jnp.take) for small vocabularies once that gather lowering is
    # reliable across TPU generations; the HBM DMA-gather path below is always
    # correct and never needs a vocab-sized VMEM footprint.

    out_flat = pl.pallas_call(
        _make_embed_kernel(scale, tile_t, n),
        out_shape=jax.ShapeDtypeStruct((n_pad, d_model), embedding_table.dtype),
        grid_spec=pltpu.PrefetchScalarGridSpec(
            num_scalar_prefetch=1,                         # ids -> SMEM
            grid=(n_pad // tile_t,),
            in_specs=[pl.BlockSpec(memory_space=pl.ANY)],  # table stays in HBM
            out_specs=pl.BlockSpec((tile_t, d_model), lambda i, ids: (i, 0)),
            scratch_shapes=[pltpu.SemaphoreType.DMA((1,))],
        ),
        compiler_params=pltpu.CompilerParams(
            dimension_semantics=("parallel",),
            vmem_limit_bytes=vmem_limit,
        ),
    )(ids, embedding_table)

    return out_flat[:n].reshape(batch, seq, d_model)


if __name__ == "__main__":
    # Small shapes; d_model=128 keeps the output lane-dense (multiple of 128).
    d_model = 128
    vocab_size = 512
    batch, seq = 2, 8

    key = jax.random.PRNGKey(0)
    k_emb, k_ids = jax.random.split(key)

    # Deterministic synthetic parameters (nn.Embedding weight ~ N(0, 1)).
    embedding_table = jax.random.normal(k_emb, (vocab_size, d_model),
                                        dtype=jnp.float32)
    x = jax.random.randint(k_ids, (batch, seq), 0, vocab_size, dtype=jnp.int32)

    out = input_embeddings(x, embedding_table)
    out = jax.block_until_ready(out)

    # Reference check against plain JAX gather.
    ref = jnp.take(embedding_table, x, axis=0) * math.sqrt(d_model)
    assert out.shape == (batch, seq, d_model)
    assert jnp.allclose(out, ref, rtol=1e-6, atol=1e-6)

    print("KERNEL_OK")
</pallas_src>

<mosaic_0001>
module attributes {stable_mosaic.version = 11 : i64} {
  func.func @kernel(%arg0: i32, %arg1: memref<16xi32, #tpu.memory_space<smem>>, %arg2: memref<512x128xf32, #tpu.memory_space<any>>, %arg3: memref<8x128xf32, #tpu.memory_space<vmem>>, %arg4: memref<1x!tpu.dma_semaphore, #tpu.memory_space<semaphore_mem>>) attributes {dimension_semantics = [#tpu.dimension_semantics<parallel>], iteration_bounds = array<i64: 2>, scalar_prefetch = 1 : i64, scratch_operands = 1 : i64, tpu.core_type = #tpu.core_type<tc>, window_params = [{}, {transform_indices = @transform_1, window_bounds = array<i64: 8, 128>}]} {
    %c8_i32 = arith.constant 8 : i32
    %0 = arith.muli %arg0, %c8_i32 : i32
    %c16_i32 = arith.constant 16 : i32
    %1 = arith.subi %c16_i32, %0 : i32
    %c8_i32_0 = arith.constant 8 : i32
    %2 = arith.minsi %1, %c8_i32_0 : i32
    %c0_i32 = arith.constant 0 : i32
    %3 = arith.subi %2, %c0_i32 : i32
    %c1_i32 = arith.constant 1 : i32
    %c1_i32_1 = arith.constant 1 : i32
    %4 = arith.subi %c1_i32, %c1_i32_1 : i32
    %5 = arith.addi %3, %4 : i32
    %c1_i32_2 = arith.constant 1 : i32
    %6 = arith.divsi %5, %c1_i32_2 : i32
    %c1_i32_3 = arith.constant 1 : i32
    %c0_i32_4 = arith.constant 0 : i32
    %c0_i32_5 = arith.constant 0 : i32
    %7 = arith.subi %6, %c0_i32_5 : i32
    %8 = arith.addi %c0_i32_5, %7 : i32
    %c1_i32_6 = arith.constant 1 : i32
    scf.for %arg5 = %c0_i32_5 to %8 step %c1_i32_6  : i32 {
      %19 = arith.muli %arg5, %c1_i32_3 : i32
      %20 = arith.addi %c0_i32_4, %19 : i32
      %21 = arith.addi %0, %20 : i32
      %22 = arith.index_cast %21 : i32 to index
      %23 = memref.load %arg1[%22] : memref<16xi32, #tpu.memory_space<smem>>
      %c0_i32_18 = arith.constant 0 : i32
      %c0_i32_19 = arith.constant 0 : i32
      %24 = tpu.memref_slice %arg2[%23, %c0_i32_19] : memref<512x128xf32, #tpu.memory_space<any>> -> memref<1x128xf32, #tpu.memory_space<any>>
      %c0_i32_20 = arith.constant 0 : i32
      %25 = tpu.memref_slice %arg3[%20, %c0_i32_20] : memref<8x128xf32, #tpu.memory_space<vmem>> -> memref<1x128xf32, #tpu.memory_space<vmem>>
      %26 = tpu.memref_slice %arg4[%c0_i32_18] : memref<1x!tpu.dma_semaphore, #tpu.memory_space<semaphore_mem>> -> memref<1x!tpu.dma_semaphore, #tpu.memory_space<semaphore_mem>>
      %27 = tpu.memref_squeeze %26 : memref<1x!tpu.dma_semaphore, #tpu.memory_space<semaphore_mem>> -> memref<!tpu.dma_semaphore, #tpu.memory_space<semaphore_mem>>
      tpu.enqueue_dma source(%24 : memref<1x128xf32, #tpu.memory_space<any>>) target(%25 : memref<1x128xf32, #tpu.memory_space<vmem>>) target_semaphore(%27 : memref<!tpu.dma_semaphore, #tpu.memory_space<semaphore_mem>>)
    }
    %c0_i32_7 = arith.constant 0 : i32
    %9 = arith.subi %2, %c0_i32_7 : i32
    %c1_i32_8 = arith.constant 1 : i32
    %c1_i32_9 = arith.constant 1 : i32
    %10 = arith.subi %c1_i32_8, %c1_i32_9 : i32
    %11 = arith.addi %9, %10 : i32
    %c1_i32_10 = arith.constant 1 : i32
    %12 = arith.divsi %11, %c1_i32_10 : i32
    %c1_i32_11 = arith.constant 1 : i32
    %c0_i32_12 = arith.constant 0 : i32
    %c0_i32_13 = arith.constant 0 : i32
    %13 = arith.subi %12, %c0_i32_13 : i32
    %14 = arith.addi %c0_i32_13, %13 : i32
    %c1_i32_14 = arith.constant 1 : i32
    scf.for %arg5 = %c0_i32_13 to %14 step %c1_i32_14  : i32 {
      %19 = arith.muli %arg5, %c1_i32_11 : i32
      %20 = arith.addi %c0_i32_12, %19 : i32
      %c0_i32_18 = arith.constant 0 : i32
      %c0_i32_19 = arith.constant 0 : i32
      %c0_i32_20 = arith.constant 0 : i32
      %21 = tpu.memref_slice %arg2[%c0_i32_19, %c0_i32_20] : memref<512x128xf32, #tpu.memory_space<any>> -> memref<1x128xf32, #tpu.memory_space<any>>
      %c0_i32_21 = arith.constant 0 : i32
      %c0_i32_22 = arith.constant 0 : i32
      %22 = tpu.memref_slice %arg3[%c0_i32_21, %c0_i32_22] : memref<8x128xf32, #tpu.memory_space<vmem>> -> memref<1x128xf32, #tpu.memory_space<vmem>>
      %23 = tpu.memref_slice %arg4[%c0_i32_18] : memref<1x!tpu.dma_semaphore, #tpu.memory_space<semaphore_mem>> -> memref<1x!tpu.dma_semaphore, #tpu.memory_space<semaphore_mem>>
      %24 = tpu.memref_squeeze %23 : memref<1x!tpu.dma_semaphore, #tpu.memory_space<semaphore_mem>> -> memref<!tpu.dma_semaphore, #tpu.memory_space<semaphore_mem>>
      tpu.wait_dma2 semaphore(%24 : memref<!tpu.dma_semaphore, #tpu.memory_space<semaphore_mem>>) src(%21 : memref<1x128xf32, #tpu.memory_space<any>>) dst(%22 : memref<1x128xf32, #tpu.memory_space<vmem>>)
    }
    %c0 = arith.constant 0 : index
    %c0_15 = arith.constant 0 : index
    %15 = vector.load %arg3[%c0, %c0_15] : memref<8x128xf32, #tpu.memory_space<vmem>>, vector<8x128xf32>
    %cst = arith.constant 11.3137083 : f32
    %16 = vector.broadcast %cst : f32 to vector<8x128xf32>
    %17 = arith.mulf %15, %16 : vector<8x128xf32>
    %c0_16 = arith.constant 0 : index
    %c0_17 = arith.constant 0 : index
    %18 = vector.load %arg3[%c0_16, %c0_17] : memref<8x128xf32, #tpu.memory_space<vmem>>, vector<8x128xf32>
    tpu.vector_store %arg3[%c0_16, %c0_17], %17 {strides = array<i32>} : memref<8x128xf32, #tpu.memory_space<vmem>>, vector<8x128xf32>,
    return
  }
  func.func @transform_1(%arg0: i32, %arg1: memref<16xi32, #tpu.memory_space<smem>>) -> (i32, i32) {
    %c0_i32 = arith.constant 0 : i32
    %c0_i32_0 = arith.constant 0 : i32
    return %arg0, %c0_i32 : i32, i32
  }
}

</mosaic_0001>

<bundles_post_ra>
// kernel: tpu_custom_call.1
= control target key start
LH: loop header
LB: loop body
LE: loop exit
PB: predicated region body
PF: predicated region fallthrough
CT: control target
= control target key end

     0   :  { %s501_s0 = inlined_call_operand.hbm [shape: s32[16], index: 0, kind: input, shape index: {}]   ;;  %s502_s1 = inlined_call_operand.hbm [shape: f32[512,128], index: 1, kind: input, shape index: {}]   ;;  %s503_s2 = inlined_call_operand.hbm [shape: f32[16,128], index: 2, kind: output, shape index: {}]  }
   0x1   :  { %s233_s11 = scalar_lea.hbm %s501_s0, 16 }
   0x2   :  { %p234_p0 = scmp.ne.s32.totalorder %s501_s0, %s233_s11  ;;  %p237_p1 = scmp.lt.u32.totalorder %s233_s11, %s501_s0 }
   0x4   :  { %p239_p2 = pnand %p237_p1, %p234_p0 }
   0x6   :  { %242 = shalt.err (!%p239_p2)  }
   0x7   :  { %s343_s16 = smov [#allocation4]  }
   0x8   :  { %8 = dma.hbm_to_smem %s501_s0, 16, %s343_s16, [#allocation3] }
   0x9   :  { %315 = dma.done.wait [#allocation3], 16 }
   0xa   :  { %316 = vsyncadd [#allocation3], 4294967280 }
   0xb   :  { %10 = sfence }
   0xc   :  { %11 = vsyncpa [#allocation6], 0 }
   0xd   :  { %13 = vsyncpa [#allocation6 + $0x1], 0  ;;  %s373_s19 = smov 0   ;;  %s375_s20 = smov 0  }
   0xe   :  { %s377_s21 = smov 0  }
   0xf LB: > { %s166_s0 = sadd.s32 4294967295, %s333_s21   ;;  %s390_s22 = sadd.s32 1, %s333_s21   ;;  %s333_s21 = sphi %s377_s21, %s510_s21   ;;  %s329_s20 = sphi %s375_s20, %s509_s20   ;;  %s325_s19 = sphi %s373_s19, %s508_s19  }
  0x10   : > { %s22_s23 = ssub.s32 %s333_s21, %s390_s22  ;;  %s25_s24 = sadd.s32 1, %s329_s20 }
  0x11   : > { %p23_p3 = scmp.eq.s32.totalorder %s22_s23, 0  ;;  %p167_p4 = scmp.ne.s32.totalorder %s22_s23, 0 }
  0x12   : > { %p29_p5 = scmp.eq.s32.totalorder %s333_s21, 1  ;;  %p34_p6 = scmp.ne.s32.totalorder %s329_s20, %s325_s19 }
  0x13   : > { %s399_s25 = scalar_select %p23_p3, %s329_s20, %s25_s24  }
  0x14   : > { %p401_p7 = por %p167_p4, %p29_p5  ;;  %p35_p8 = scmp.eq.s32.totalorder %s166_s0, 1 }
  0x15   : > { %p168_p10 = scmp.ge.s32.totalorder %s333_s21, 2 }
  0x16   : > { %p405_p9 = por %p35_p8, %p34_p6  ;;  %s49_s28 = sand.u32 (!%p168_p10), 1, %s329_s20  }
  0x17   : > { %44 = sbr.rel (%p168_p10) target bundleno = 122 (0x7a), region = 12  ;;  %s170_s29 = sshll.u32 (!%p168_p10), %s333_s21, 3 }
  0x18   : > { %s169_s30 = sshll.u32 (!%p168_p10), %s49_s28, 3  ;;  %s416_s3 = ssub.s32 (!%p168_p10), 16, %s170_s29 }
  0x19   : > { %p54_p11 = scmp.lt.s32.totalorder (!%p168_p10), %s416_s3, 8  ;;  %s422_s5 = scalar_lea.vmem (!%p168_p10), [#allocation5], %s169_s30 }
  0x1a   : > { %p504_p12 = scmp.le.s32.totalorder (!%p168_p10), %s416_s3, 0 }
  0x1e   : > { %s420_s4 = scalar_select %p54_p11, %s416_s3, 8 }
  0x1f   : > { %147 = sbr.rel (%p504_p12) target bundleno = 78 (0x4e), region = 58  ;;  %s427_s6 = smov (!%p504_p12), 0  }
  0x26 LB: >> { %s62_s7 = sadd.s32 %s337_s6, %s170_s29  ;;  %s66_s8 = scalar_lea.vmem %s422_s5, %s337_s6 [#allocation5]  ;;  %s337_s6 = sphi %s427_s6, %s59_s6  }
  0x27   : >> { %s63_s9 = sld [smem:[#allocation4 + %s62_s7]]  ;;  %s74_s10 = sshll.u32 %s66_s8, 4  ;;  %s75_s10 = int_to_ptr.vmem [resolvable:$true] %s74_s10 }
  0x28   : >> { %s245_s18 = scalar_lea.hbm %s502_s1, 8192 }
  0x2d   : >> { %s172_s11 = sshll.u32 %s63_s9, 4 }
  0x2e   : >> { %s65_s14 = scalar_lea.hbm %s502_s1, %s172_s11 }
  0x2f   : >> { %s243_s15 = scalar_lea.hbm %s65_s14, 16  ;;  %p246_p0 = scmp.lt.u32.totalorder %s65_s14, %s502_s1 }
  0x30   : >> { %p244_p13 = scmp.ne.s32.totalorder %s65_s14, %s243_s15  ;;  %p247_p1 = scmp.lt.u32.totalorder %s245_s18, %s243_s15 }
  0x31   : >> { %p249_p3 = scmp.lt.u32.totalorder %s243_s15, %s65_s14 }
  0x32   : >> { %p248_p2 = por %p247_p1, %p246_p0 }
  0x34   : >> { %p250_p4 = por %p249_p3, %p248_p2 }
  0x36   : >> { %p251_p5 = pnand %p250_p4, %p244_p13 }
  0x38   : >> { %254 = shalt.err (!%p251_p5)  }
  0x39   : >> { %s255_s24 = scalar_lea.vmem %s75_s10, 16  ;;  %s344_s30 = smov [#allocation5]  }
  0x3a   : >> { %p256_p6 = scmp.ne.s32.totalorder %s75_s10, %s255_s24  ;;  %s257_s7 = sshll.u32 %s344_s30, 4  ;;  %s258_s7 = int_to_ptr.vmem [resolvable:$false] %s257_s7 }
  0x3b   : >> { %s259_s8 = scalar_lea.vmem %s258_s7, 256  ;;  %p260_p8 = scmp.lt.s32.totalorder %s75_s10, %s258_s7 }
  0x3c   : >> { %p261_p10 = scmp.lt.s32.totalorder %s259_s8, %s255_s24 }
  0x3e   : >> { %p262_p11 = por %p261_p10, %p260_p8 }
  0x40   : >> { %p263_p12 = pnand %p262_p11, %p256_p6 }
  0x42   : >> { %266 = shalt.err (!%p263_p12)  }
  0x43   : >> { %77 = dma.hbm_to_vmem [thread:$0]  %s65_s14, 16, %s75_s10, [#allocation2] }
  0x44   : >> { %s59_s6 = sadd.s32 1, %s337_s6  }
  0x45   : >> { %p58_p0 = scmp.ge.s32.totalorder %s59_s6, %s420_s4 }
  0x47   : > { %61 = sbr.rel (!%p58_p0) target bundleno = 38 (0x26), region = 64 }
  0x4e PF: > { %p507_p13 = scmp.le.s32.totalorder %s416_s3, 0 }
  0x4f   : > { %s339_s9 = smov (!%p507_p13), 0  }
  0x50   : > { %152 = sbr.rel (%p507_p13) target bundleno = 98 (0x62), region = 69 }
  0x57 LB: >> { %317 = dma.done.wait [#allocation2], 16  ;;  %s341_s9 = sphi %s339_s9, %s81_s9  }
  0x58   : >> { %318 = vsyncadd [#allocation2], 4294967280  ;;  %s81_s9 = sadd.s32 1, %s341_s9  }
  0x59   : >> { %p80_p12 = scmp.ge.s32.totalorder %s81_s9, %s420_s4 }
  0x5b   : > { %83 = sbr.rel (!%p80_p12) target bundleno = 87 (0x57), region = 75 }
  0x62 PF: > { %s175_s29 = sshll.u32 %s333_s21, 7  ;;  %s104_s11 = sshll.u32 %s422_s5, 4  ;;  %s461_s11 = int_to_ptr.vmem [resolvable:$true] %s104_s11 }
  0x63   : > { %v87_v0 = vld [vmem:[%s422_s5] sm:$0xff]  ;;  %s458_s10 = scalar_lea.hbm %s503_s2, %s175_s29  ;;  %s91_s4 = scalar_lea.sflag [#allocation6], %s49_s28 }
  0x64   : > { %v88_v1 = vmul.f32 11.313708, %v87_v0  ;;  %s267_s12 = scalar_lea.vmem %s461_s11, 128  ;;  %s345_s13 = smov [#allocation5]  }
  0x65   : > { %p268_p1 = scmp.ne.s32.totalorder %s461_s11, %s267_s12  ;;  %s271_s14 = sshll.u32 %s345_s13, 4  ;;  %s272_s14 = int_to_ptr.vmem [resolvable:$false] %s271_s14 }
  0x66   : > { %89 = vst [vmem:[%s422_s5] sm:$0xff] %v88_v1  ;;  %s273_s15 = scalar_lea.vmem %s272_s14, 256  ;;  %p274_p4 = scmp.lt.s32.totalorder %s461_s11, %s272_s14 }
  0x67   : > { %p269_p2 = pnand %p268_p1, %p401_p7  ;;  %p275_p5 = scmp.lt.s32.totalorder %s273_s15, %s267_s12 }
  0x69   : > { %p270_p3 = pneg %p269_p2  ;;  %p276_p6 = por %p275_p5, %p274_p4 }
  0x6b   : > { %p277_p8 = pnand %p276_p6, %p270_p3 }
  0x6d   : > { %280 = shalt.err (!%p277_p8)
}
  0x6e   : > { %s281_s28 = scalar_lea.hbm %s458_s10, 128  ;;  %s285_s17 = scalar_lea.hbm %s503_s2, 256 }
  0x6f   : > { %p282_p10 = scmp.ne.s32.totalorder %s458_s10, %s281_s28  ;;  %p286_p13 = scmp.lt.u32.totalorder %s458_s10, %s503_s2 }
  0x70   : > { %p287_p12 = scmp.lt.u32.totalorder %s285_s17, %s281_s28  ;;  %p289_p2 = scmp.lt.u32.totalorder %s281_s28, %s458_s10 }
  0x71   : > { %p283_p11 = pnand %p282_p10, %p401_p7 }
  0x72   : > { %p288_p1 = por %p287_p12, %p286_p13 }
  0x73   : > { %p284_p0 = pneg %p283_p11 }
  0x74   : > { %p290_p3 = por %p289_p2, %p288_p1 }
  0x76   : > { %p291_p4 = pnand %p290_p3, %p284_p0 }
  0x78   : > { %294 = shalt.err (!%p291_p4)
}
  0x79   : > { %185 = dma.vmem_to_hbm [thread:$0]  (%p401_p7), %s461_s11, 128, %s458_s10, %s91_s4  }
  0x7a PF: > { %p191_p5 = scmp.ge.s32.totalorder %s333_s21, 1  ;;  %s116_s23 = sand.u32 1, %s325_s19  }
  0x7b   : > { %s117_s24 = scalar_lea.sflag [#allocation6], %s116_s23 }
  0x7c   : > { %p188_p6 = pnand %p191_p5, %p405_p9 }
  0x7e   : > { %320 = dma.done.wait (!%p188_p6), %s117_s24, 128  }
  0x7f   : > { %322 = vsyncadd (!%p188_p6), %s117_s24, 4294967168  ;;  %p16_p8 = scmp.ge.s32.totalorder %s390_s22, 3   ;;  %s508_s19 = smov %s329_s20 }
  0x80   : > { %s509_s20 = smov %s399_s25  ;;  %s510_s21 = smov %s390_s22 }
  0x81   :  { %18 = sbr.rel (!%p16_p8) target bundleno = 15 (0xf), region = 86 }
  0x88   :  { %122 = vsyncpa [#allocation6], 1 }
  0x89   :  { %124 = vsyncpa [#allocation6 + $0x1], 1 }
  0x8a   :  { %125 = vsyncmov [#allocation2] }
  0x8d   :  { %s126_s21 = vpop.sfrf %125 }
  0x8e   :  { %p178_p7 = scmp.ne.s32.totalorder %s126_s21, 0 }
  0x90   :  { %130 = shalt.err (%p178_p7)  }

</bundles_post_ra>
